<compile_context>
chip_gen: v7x
topology: tpu7x:2x2x1
jax: 0.10.0
libtpu: 0.0.40
codegen_flags: <defaults>
</compile_context>

<pallas_src>
import functools

import jax
import jax.numpy as jnp
from jax.experimental import pallas as pl
from jax.experimental.pallas import tpu as pltpu

EPSILON = 1e-06


def _focal_loss_kernel(logits_ref, targets_ref, partial_ref, *, gamma, alpha,
                       num_classes):
    # logits_ref : (C, block_rows, 128)  -- classes major, anchors dense
    # targets_ref: (block_rows, 128) int32
    # partial_ref: (1, 8, 128) float32   -- per-tile partial sum
    t = targets_ref[...]                                       # (br, 128) i32

    # Unrolled softmax pieces over the small, static class axis; all math below
    # runs on dense (block_rows, 128) slabs (full vreg occupancy).
    rows = [logits_ref[c].astype(jnp.float32) for c in range(num_classes)]
    m = rows[0]
    for r in rows[1:]:
        m = jnp.maximum(m, r)
    es = [jnp.exp(r - m) for r in rows]                        # C exps / anchor
    sum_e = es[0]
    for e in es[1:]:
        sum_e = sum_e + e

    # Reusable per-class masks: gather exp(x_target), pick alpha, and build the
    # validity mask (OR of the masks), which also zeroes padded anchors (t=-1).
    masks = [t == c for c in range(num_classes)]
    e_t = jnp.where(masks[0], es[0], jnp.float32(0.0))
    for c in range(1, num_classes):
        e_t = jnp.where(masks[c], es[c], e_t)
    valid = masks[0]
    for c in range(1, num_classes):
        valid = jnp.logical_or(valid, masks[c])

    # Approx reciprocal runs on the (otherwise idle) EUP slot; one Newton step
    # restores ~full f32 accuracy with two cheap VPU ops.
    inv = pl.reciprocal(sum_e, approx=True)
    inv = inv * (2.0 - sum_e * inv)
    p_t = e_t * inv                                            # softmax prob

    one_minus_p = 1.0 - p_t
    g = float(gamma)
    if g == int(g) and g >= 1.0:
        # Integral gamma (canonical 2.0): gamma-1 multiplies, no pow/exp/log.
        focal = one_minus_p
        for _ in range(int(g) - 1):
            focal = focal * one_minus_p
    elif g == 0.0:
        focal = jnp.ones_like(one_minus_p)
    else:
        focal = one_minus_p ** g          # non-integral gamma: single pow

    alpha_t = jnp.where(masks[0], jnp.float32(1.0 - alpha), jnp.float32(alpha))

    # TODO(synk): the original code asserts torch.isnan(losses).sum() == 0 at
    # runtime; no in-kernel assertion is emitted here.
    row_loss = jnp.where(valid, -alpha_t * focal * jnp.log(p_t + EPSILON),
                         jnp.float32(0.0))

    # Fold (block_rows, 128) -> (8, 128) partial with pure vreg adds (the
    # reshape splits only the major sublane axis, so it is layout-free).
    br = row_loss.shape[0]
    partial = jnp.sum(row_loss.reshape(br // 8, 8, 128), axis=0)
    partial_ref[...] = partial.reshape(1, 8, 128)


def softmax_focal_loss(logits, targets, gamma, alpha, *, block_rows=256):
    """logits: (N, C) float; targets: (N,) int.  Returns scalar f32 loss."""
    N, C = logits.shape

    rows = pl.cdiv(N, 128)                 # 128-anchor lane rows needed
    rows8 = pl.cdiv(rows, 8) * 8           # 8-aligned (sublane) row count

    desired = max(8, (int(block_rows) // 8) * 8)
    num_tiles = pl.cdiv(rows8, desired)
    if rows8 >= 16:                        # enough work -> >=2 tiles so the
        num_tiles = max(num_tiles, 2)      # parallel axis shards v7x's 2 TCs
    block_rows = pl.cdiv(pl.cdiv(rows8, num_tiles), 8) * 8
    rows_pad = num_tiles * block_rows
    n_pad = rows_pad * 128

    # NOTE: ideally upstream produces logits directly in this (C, rows, 128)
    # layout so this prep pass disappears; here it is a single fused XLA
    # transpose+pad+reshape and the input dtype is preserved (no f32 upcast —
    # the kernel casts per class row).
    logits_rs = jnp.pad(jnp.transpose(logits),
                        ((0, 0), (0, n_pad - N))).reshape(C, rows_pad, 128)
    targets_rs = jnp.pad(targets.astype(jnp.int32), (0, n_pad - N),
                         constant_values=-1).reshape(rows_pad, 128)

    kernel = functools.partial(_focal_loss_kernel, gamma=float(gamma),
                               alpha=float(alpha), num_classes=C)

    partials = pl.pallas_call(
        kernel,
        out_shape=jax.ShapeDtypeStruct((num_tiles, 8, 128), jnp.float32),
        grid_spec=pltpu.PrefetchScalarGridSpec(
            num_scalar_prefetch=0,
            grid=(num_tiles,),
            in_specs=[
                pl.BlockSpec((C, block_rows, 128), lambda i: (0, i, 0)),
                pl.BlockSpec((block_rows, 128), lambda i: (i, 0)),
            ],
            out_specs=pl.BlockSpec((1, 8, 128), lambda i: (i, 0, 0)),
        ),
        compiler_params=pltpu.CompilerParams(
            dimension_semantics=("parallel",)),
    )(logits_rs, targets_rs)

    # Tiny final reduction over per-tile partials (grid*8*128 f32).
    return partials.sum()


def _reference_loss(logits, targets, gamma, alpha):
    # Pure-JAX reference mirroring softmax_focal_loss_cuda exactly.
    N, C = logits.shape
    p = jax.nn.softmax(logits.astype(jnp.float32), axis=1)
    class_range = jnp.arange(C, dtype=jnp.int32)[None, :]
    t = targets.astype(jnp.int32)[:, None]
    term1 = (1.0 - p) ** gamma * jnp.log(p + EPSILON)
    alpha_vec = jnp.where(class_range == 0, 1.0 - alpha, alpha).astype(jnp.float32)
    losses = -(t == class_range).astype(jnp.float32) * term1 * alpha_vec
    return losses.sum(axis=1, keepdims=True).sum()


if __name__ == "__main__":
    # SoftmaxFocalLoss(gamma=2.0, alpha=0.25)
    gamma, alpha = 2.0, 0.25

    key = jax.random.PRNGKey(0)
    k1, k2 = jax.random.split(key)
    N, C = 512, 3  # C=3 per the hard-coded alpha vector in the original module
    logits = jax.random.normal(k1, (N, C), dtype=jnp.float32)
    targets = jax.random.randint(k2, (N,), 0, C, dtype=jnp.int32)

    loss = softmax_focal_loss(logits, targets, gamma, alpha)
    loss = jax.block_until_ready(loss)

    ref = _reference_loss(logits, targets, gamma, alpha)
    assert jnp.allclose(loss, ref, rtol=1e-4, atol=1e-4), (loss, ref)

    print("KERNEL_OK")
</pallas_src>

<mosaic_0001>
module attributes {stable_mosaic.version = 11 : i64} {
  func.func @_focal_loss_kernel(%arg0: i32, %arg1: memref<3x8x128xf32, #tpu.memory_space<vmem>>, %arg2: memref<8x128xi32, #tpu.memory_space<vmem>>, %arg3: memref<1x8x128xf32, #tpu.memory_space<vmem>>) attributes {dimension_semantics = [#tpu.dimension_semantics<parallel>], iteration_bounds = array<i64: 1>, scalar_prefetch = 0 : i64, scratch_operands = 0 : i64, tpu.core_type = #tpu.core_type<tc>, window_params = [{transform_indices = @transform_0, window_bounds = array<i64: 3, 8, 128>}, {transform_indices = @transform_1, window_bounds = array<i64: 8, 128>}, {transform_indices = @transform_2, window_bounds = array<i64: 1, 8, 128>}]} {
    %c0 = arith.constant 0 : index
    %c0_0 = arith.constant 0 : index
    %0 = vector.load %arg2[%c0, %c0_0] : memref<8x128xi32, #tpu.memory_space<vmem>>, vector<8x128xi32>
    %c0_1 = arith.constant 0 : index
    %c0_2 = arith.constant 0 : index
    %c0_3 = arith.constant 0 : index
    %1 = vector.load %arg1[%c0_1, %c0_2, %c0_3] : memref<3x8x128xf32, #tpu.memory_space<vmem>>, vector<1x8x128xf32>
    %2 = vector.shape_cast %1 : vector<1x8x128xf32> to vector<8x128xf32>
    %c1 = arith.constant 1 : index
    %c0_4 = arith.constant 0 : index
    %c0_5 = arith.constant 0 : index
    %3 = vector.load %arg1[%c1, %c0_4, %c0_5] : memref<3x8x128xf32, #tpu.memory_space<vmem>>, vector<1x8x128xf32>
    %4 = vector.shape_cast %3 : vector<1x8x128xf32> to vector<8x128xf32>
    %c2 = arith.constant 2 : index
    %c0_6 = arith.constant 0 : index
    %c0_7 = arith.constant 0 : index
    %5 = vector.load %arg1[%c2, %c0_6, %c0_7] : memref<3x8x128xf32, #tpu.memory_space<vmem>>, vector<1x8x128xf32>
    %6 = vector.shape_cast %5 : vector<1x8x128xf32> to vector<8x128xf32>
    %7 = arith.maximumf %2, %4 : vector<8x128xf32>
    %8 = arith.maximumf %7, %6 : vector<8x128xf32>
    %9 = arith.subf %2, %8 : vector<8x128xf32>
    %10 = math.exp %9 : vector<8x128xf32>
    %11 = arith.subf %4, %8 : vector<8x128xf32>
    %12 = math.exp %11 : vector<8x128xf32>
    %13 = arith.subf %6, %8 : vector<8x128xf32>
    %14 = math.exp %13 : vector<8x128xf32>
    %15 = arith.addf %10, %12 : vector<8x128xf32>
    %16 = arith.addf %15, %14 : vector<8x128xf32>
    %c0_i32 = arith.constant 0 : i32
    %17 = vector.broadcast %c0_i32 : i32 to vector<8x128xi32>
    %18 = arith.cmpi eq, %0, %17 : vector<8x128xi32>
    %c1_i32 = arith.constant 1 : i32
    %19 = vector.broadcast %c1_i32 : i32 to vector<8x128xi32>
    %20 = arith.cmpi eq, %0, %19 : vector<8x128xi32>
    %c2_i32 = arith.constant 2 : i32
    %21 = vector.broadcast %c2_i32 : i32 to vector<8x128xi32>
    %22 = arith.cmpi eq, %0, %21 : vector<8x128xi32>
    %cst = arith.constant 0.000000e+00 : f32
    %23 = vector.broadcast %cst : f32 to vector<8x128xf32>
    %24 = arith.select %18, %10, %23 : vector<8x128xi1>, vector<8x128xf32>
    %25 = arith.select %20, %12, %24 : vector<8x128xi1>, vector<8x128xf32>
    %26 = arith.select %22, %14, %25 : vector<8x128xi1>, vector<8x128xf32>
    %27 = arith.ori %18, %20 : vector<8x128xi1>
    %28 = arith.ori %27, %22 : vector<8x128xi1>
    %29 = tpu.reciprocal %16 {approx = true} : vector<8x128xf32> -> vector<8x128xf32>
    %30 = arith.mulf %16, %29 : vector<8x128xf32>
    %cst_8 = arith.constant 2.000000e+00 : f32
    %31 = vector.broadcast %cst_8 : f32 to vector<8x128xf32>
    %32 = arith.subf %31, %30 : vector<8x128xf32>
    %33 = arith.mulf %29, %32 : vector<8x128xf32>
    %34 = arith.mulf %26, %33 : vector<8x128xf32>
    %cst_9 = arith.constant 1.000000e+00 : f32
    %35 = vector.broadcast %cst_9 : f32 to vector<8x128xf32>
    %36 = arith.subf %35, %34 : vector<8x128xf32>
    %37 = arith.mulf %36, %36 : vector<8x128xf32>
    %cst_10 = arith.constant 7.500000e-01 : f32
    %cst_11 = arith.constant 2.500000e-01 : f32
    %38 = vector.broadcast %cst_10 : f32 to vector<8x128xf32>
    %39 = vector.broadcast %cst_11 : f32 to vector<8x128xf32>
    %40 = arith.select %18, %38, %39 : vector<8x128xi1>, vector<8x128xf32>
    %cst_12 = arith.constant 0.000000e+00 : f32
    %41 = vector.broadcast %cst_12 : f32 to vector<8x128xf32>
    %42 = arith.subf %41, %40 : vector<8x128xf32>
    %43 = arith.mulf %42, %37 : vector<8x128xf32>
    %cst_13 = arith.constant 9.99999997E-7 : f32
    %44 = vector.broadcast %cst_13 : f32 to vector<8x128xf32>
    %45 = arith.addf %34, %44 : vector<8x128xf32>
    %46 = math.log %45 : vector<8x128xf32>
    %47 = arith.mulf %43, %46 : vector<8x128xf32>
    %cst_14 = arith.constant 0.000000e+00 : f32
    %48 = vector.broadcast %cst_14 : f32 to vector<8x128xf32>
    %49 = arith.select %28, %47, %48 : vector<8x128xi1>, vector<8x128xf32>
    %50 = vector.shape_cast %49 : vector<8x128xf32> to vector<1x8x128xf32>
    %cst_15 = arith.constant dense<0.000000e+00> : vector<8x128xf32>
    %51 = vector.multi_reduction <add>, %50, %cst_15 [0] : vector<1x8x128xf32> to vector<8x128xf32>
    %52 = vector.shape_cast %51 : vector<8x128xf32> to vector<1x8x128xf32>
    %c0_16 = arith.constant 0 : index
    %c0_17 = arith.constant 0 : index
    %c0_18 = arith.constant 0 : index
    %53 = vector.load %arg3[%c0_16, %c0_17, %c0_18] : memref<1x8x128xf32, #tpu.memory_space<vmem>>, vector<1x8x128xf32>
    tpu.vector_store %arg3[%c0_16, %c0_17, %c0_18], %52 {strides = array<i32>} : memref<1x8x128xf32, #tpu.memory_space<vmem>>, vector<1x8x128xf32>,
    return
  }
  func.func @transform_0(%arg0: i32) -> (i32, i32, i32) {
    %c0_i32 = arith.constant 0 : i32
    %c0_i32_0 = arith.constant 0 : i32
    %c0_i32_1 = arith.constant 0 : i32
    return %c0_i32, %arg0, %c0_i32_0 : i32, i32, i32
  }
  func.func @transform_1(%arg0: i32) -> (i32, i32) {
    %c0_i32 = arith.constant 0 : i32
    %c0_i32_0 = arith.constant 0 : i32
    return %arg0, %c0_i32 : i32, i32
  }
  func.func @transform_2(%arg0: i32) -> (i32, i32, i32) {
    %c0_i32 = arith.constant 0 : i32
    %c0_i32_0 = arith.constant 0 : i32
    %c0_i32_1 = arith.constant 0 : i32
    return %arg0, %c0_i32, %c0_i32_0 : i32, i32, i32
  }
}

</mosaic_0001>

<bundles_post_ra>
// kernel: tpu_custom_call.1
= control target key start
LH: loop header
LB: loop body
LE: loop exit
PB: predicated region body
PF: predicated region fallthrough
CT: control target
= control target key end

     0   :  { %7 = vsyncpa [#allocation3], 0  ;;  %s250_s0 = inlined_call_operand.hbm [shape: f32[3,8,128], index: 0, kind: input, shape index: {}]   ;;  %s251_s1 = inlined_call_operand.hbm [shape: s32[8,128], index: 1, kind: input, shape index: {}]   ;;  %s252_s2 = inlined_call_operand.hbm [shape: f32[1,8,128], index: 2, kind: output, shape index: {}]  }
   0x1   :  { %8 = vsyncpa [#allocation6], 0 }
   0x2   :  { %9 = vsyncpa [#allocation4], 0  ;;  %s186_s9 = smov [#allocation2]   ;;  %s114_s13 = scalar_lea.hbm %s250_s0, 384 }
   0x3   :  { %s15_s10 = sshll.u32 %s186_s9, 4  ;;  %p115_p0 = scmp.ne.s32.totalorder %s250_s0, %s114_s13  ;;  %s16_s10 = int_to_ptr.vmem [resolvable:$true] %s15_s10 }
   0x4   :  { %p118_p1 = scmp.lt.u32.totalorder %s114_s13, %s250_s0 }
   0x6   :  { %p120_p2 = pnand %p118_p1, %p115_p0 }
   0x8   :  { %123 = shalt.err (!%p120_p2)
}
   0x9   :  { %s124_s18 = scalar_lea.vmem %s16_s10, 384  ;;  %p129_p4 = scmp.lt.s32.totalorder %s16_s10, %s16_s10 }
   0xa   :  { %p125_p3 = scmp.ne.s32.totalorder %s16_s10, %s124_s18  ;;  %p130_p5 = scmp.lt.s32.totalorder %s124_s18, %s124_s18 }
   0xc   :  { %p131_p6 = por %p130_p5, %p129_p4 }
   0xe   :  { %p132_p7 = pnand %p131_p6, %p125_p3 }
  0x10   :  { %135 = shalt.err (!%p132_p7)
}
  0x11   :  { %s187_s19 = smov 128   ;;  %s188_s20 = smov 8  }
  0x12   :  { %21 = dma.hbm_to_vmem [thread:$0]  %s250_s0, 384, %s16_s10, [#allocation3], %s187_s19, %s187_s19, %s188_s20  }
  0x13   :  { %s189_s23 = smov [#allocation5]   ;;  %s136_s27 = scalar_lea.hbm %s251_s1, 128 }
  0x14   :  { %s28_s24 = sshll.u32 %s189_s23, 4  ;;  %p137_p8 = scmp.ne.s32.totalorder %s251_s1, %s136_s27  ;;  %s29_s24 = int_to_ptr.vmem [resolvable:$true] %s28_s24 }
  0x15   :  { %p140_p9 = scmp.lt.u32.totalorder %s136_s27, %s251_s1 }
  0x17   :  { %p142_p10 = pnand %p140_p9, %p137_p8 }
  0x19   :  { %145 = shalt.err (!%p142_p10)
}
  0x1a   :  { %s146_s4 = scalar_lea.vmem %s29_s24, 128  ;;  %p151_p12 = scmp.lt.s32.totalorder %s29_s24, %s29_s24 }
  0x1b   :  { %p147_p11 = scmp.ne.s32.totalorder %s29_s24, %s146_s4  ;;  %p152_p13 = scmp.lt.s32.totalorder %s146_s4, %s146_s4 }
  0x1d   :  { %p153_p0 = por %p152_p13, %p151_p12 }
  0x1f   :  { %p154_p1 = pnand %p153_p0, %p147_p11 }
  0x21   :  { %157 = shalt.err (!%p154_p1)
}
  0x22   :  { %31 = dma.hbm_to_vmem [thread:$0]  %s251_s1, 128, %s29_s24, [#allocation6]  }
  0x23   :  { %180 = dma.done.wait [#allocation3], 384  }
  0x24   :  { %181 = vsyncadd [#allocation3], 4294966912 }
  0x25   :  { %182 = dma.done.wait [#allocation6], 128  }
  0x26   :  { %183 = vsyncadd [#allocation6], 4294967168  ;;  %v39_v0 = vld [vmem:[#allocation2] sm:$0xff]  ;;  %v41_v1 = vld [vmem:[#allocation2 + $0x8] sm:$0xff]  ;;  %v190_v27 = vmov 0.25   ;;  %s191_s1 = smov [#allocation7]  }
  0x27   :  { %v43_v2 = vld [vmem:[#allocation2 + $0x10] sm:$0xff]  ;;  %v44_v3 = vmax.f32 %v39_v0, %v41_v1  ;;  %v38_v16 = vld [vmem:[#allocation5] sm:$0xff]  ;;  %s88_s6 = sshll.u32 %s191_s1, 4  ;;  %s89_s6 = int_to_ptr.vmem [resolvable:$true] %s88_s6 }
  0x28   :  { %vm57_vm0 = vcmp.eq.s32.totalorder %v38_v16, 0  ;;  %vm58_vm1 = vcmp.eq.s32.totalorder %v38_v16, 1  ;;  %vm59_vm2 = vcmp.eq.s32.totalorder %v38_v16, 2  ;;  %s158_s7 = scalar_lea.vmem %s89_s6, 128  ;;  %p163_p3 = scmp.lt.s32.totalorder %s89_s6, %s89_s6 }
  0x29   :  { %v45_v4 = vmax.f32 %v44_v3, %v43_v2  ;;  %v72_v28 = vsel %vm57_vm0, 0.75, %v190_v27  ;;  %vm63_vm3 = vmor %vm57_vm0, %vm58_vm1  ;;  %p159_p2 = scmp.ne.s32.totalorder %s89_s6, %s158_s7  ;;  %p164_p4 = scmp.lt.s32.totalorder %s158_s7, %s158_s7 }
  0x2a   :  { %v73_v30 = vsub.f32 0.0, %v72_v28  ;;  %vm64_vm4 = vmor %vm63_vm3, %vm59_vm2 }
  0x2b   :  { %v46_v5 = vsub.f32 %v39_v0, %v45_v4  ;;  %v49_v6 = vsub.f32 %v41_v1, %v45_v4  ;;  %v52_v7 = vsub.f32 %v43_v2, %v45_v4  ;;  %p165_p5 = por %p164_p4, %p163_p3 }
  0x2d   :  { %v47_v8 = vmul.f32 1.442695, %v46_v5  ;;  %v50_v9 = vmul.f32 1.442695, %v49_v6  ;;  %v53_v10 = vmul.f32 1.442695, %v52_v7  ;;  %p166_p6 = pnand %p165_p5, %p159_p2 }
  0x2f   :  { %104 = vpow2.f32 %v47_v8 }
  0x30   :  { %106 = vpow2.f32 %v50_v9 }
  0x31   :  { %108 = vpow2.f32 %v53_v10 }
  0x39   :  { %v105_v11 = vpop.eup %104 }
  0x3a   :  { %v107_v12 = vpop.eup %106  ;;  %v60_v17 = vsel %vm57_vm0, %v105_v11, 0.0 }
  0x3b   :  { %v109_v13 = vpop.eup %108  ;;  %v55_v14 = vadd.f32 %v107_v12, %v105_v11  ;;  %v61_v19 = vsel %vm58_vm1, %v107_v12, %v60_v17 }
  0x3c   :  { %v62_v22 = vsel %vm59_vm2, %v109_v13, %v61_v19 }
  0x3d   :  { %v56_v15 = vadd.f32 %v109_v13, %v55_v14 }
  0x3f   :  { %110 = vrcp.f32 %v56_v15 }
  0x49   :  { %v111_v18 = vpop.eup %110 }
  0x4a   :  { %v66_v20 = vmul.f32 %v111_v18, %v56_v15 }
  0x4c   :  { %v67_v21 = vsub.f32 2.0, %v66_v20 }
  0x4e   :  { %v68_v23 = vmul.f32 %v111_v18, %v67_v21 }
  0x50   :  { %v69_v24 = vmul.f32 %v68_v23, %v62_v22 }
  0x52   :  { %v75_v25 = vadd.f32 1e-06, %v69_v24  ;;  %v70_v26 = vsub.f32 1.0, %v69_v24 }
  0x54   :  { %112 = vlog2.f32 %v75_v25  ;;  %v71_v29 = vmul.f32 %v70_v26, %v70_v26 }
  0x56   :  { %v74_v31 = vmul.f32 %v73_v30, %v71_v29 }
  0x5e   :  { %v113_v32 = vpop.eup %112 }
  0x5f   :  { %v77_v33 = vmul.f32 0.6931472, %v113_v32 }
  0x61   :  { %v78_v34 = vmul.f32 %v77_v33, %v74_v31 }
  0x63   :  { %v79_v35 = vsel %vm64_vm4, %v78_v34, 0.0 }
  0x64   :  { %81 = vst [vmem:[#allocation7] sm:$0xff] %v79_v35 }
  0x65   :  { %169 = shalt.err (!%p166_p6)
}
  0x66   :  { %s170_s10 = scalar_lea.hbm %s252_s2, 128 }
  0x67   :  { %p171_p7 = scmp.ne.s32.totalorder %s252_s2, %s170_s10  ;;  %p174_p8 = scmp.lt.u32.totalorder %s170_s10, %s252_s2 }
  0x69   :  { %p176_p9 = pnand %p174_p8, %p171_p7 }
  0x6b   :  { %179 = shalt.err (!%p176_p9)
}
  0x6c   :  { %91 = dma.vmem_to_hbm [thread:$0]  %s89_s6, 128, %s252_s2, [#allocation4]  }
  0x6d   :  { %184 = dma.done.wait [#allocation4], 128  }
  0x6e   :  { %185 = vsyncadd [#allocation4], 4294967168 }
  0x6f   :  { %95 = vsyncpa [#allocation3], 1 }
  0x70   :  { %96 = vsyncpa [#allocation6], 1 }
  0x71   :  { %97 = vsyncpa [#allocation4], 1 }

</bundles_post_ra>
